<compile_context>
chip_gen: v6e
topology: v6e:2x2x1
jax: 0.10.0
libtpu: 0.0.40
codegen_flags: <defaults>
</compile_context>

<pallas_src>
import math
import functools

import jax
import jax.numpy as jnp
from jax.experimental import pallas as pl
from jax.experimental.pallas import tpu as pltpu


def _logits_softmax_kernel(x_ref, wpe_ref, bpe_ref, out_ref, *, num_n, tn):
    # x_ref:   (bb, tn, D)  bf16   node-feature tile
    # wpe_ref: (bb, Ep, D)  bf16   fused (prototypes @ w_proj^T) * scale
    # bpe_ref: (bb, Ep, 1)  f32    fused (prototypes @ b_proj^T) * scale
    # out_ref: (bb, Ep, N)  f32    logits stash; softmax over N (lane axis)
    logits = jnp.einsum(
        "bef,bnf->ben", wpe_ref[...], x_ref[...],
        preferred_element_type=jnp.float32) + bpe_ref[...]

    def _softmax_lastaxis(z):
        m = jnp.max(z, axis=-1, keepdims=True)
        e = jnp.exp(z - m)                      # f32 exp (v5e-safe)
        s = jnp.sum(e, axis=-1, keepdims=True)
        # Exact reciprocal: s is only (bb, Ep, 1), so this is essentially free.
        return e * pl.reciprocal(s, approx=False)

    if num_n == 1:
        # Single node tile: fuse matmul + softmax, one lane-dense store.
        out_ref[...] = _softmax_lastaxis(logits)
    else:
        # N-tiled path: stash this tile's logits in the resident output block,
        # normalize over the full node axis in the last-step epilogue.
        n = pl.program_id(1)
        start = pl.multiple_of(n * tn, tn)       # tn is a multiple of 128 here
        out_ref[:, :, pl.ds(start, tn)] = logits

        @pl.when(n == num_n - 1)
        def _():
            out_ref[...] = _softmax_lastaxis(out_ref[...])


def _step_bytes(bb, tn, N, D, Ep):
    """Approximate per-grid-step VMEM bytes (double-buffered pipeline)."""
    in_bytes = bb * (tn * D * 2 + Ep * D * 2 + Ep * 4)   # bf16 X, bf16 W, f32 bias
    out_bytes = bb * Ep * N * 4                          # resident f32 logits/out
    return 2 * (in_bytes + out_bytes)


def _choose_blocks(B, N, D, Ep, budget_bytes):
    """Largest blocks whose double-buffered working set fits the VMEM budget.

    Prefers a batch grid of >= 4 (even) steps so both v7x TensorCores get
    work, then relaxes; prefers no N tiling (fewest grid steps), then
    128-multiple node tiles.
    """
    bb_cands = [b for b in range(B, 0, -1) if B % b == 0]
    tn_cands = [N] + [t for t in (2048, 1024, 512, 256, 128)
                      if t < N and N % t == 0]
    for min_steps, need_even in ((4, True), (2, False), (1, False)):
        for bb in bb_cands:
            steps = B // bb
            if steps < min_steps or (need_even and steps % 2 != 0):
                continue
            for tn in tn_cands:
                if _step_bytes(bb, tn, N, D, Ep) <= budget_bytes:
                    return bb, tn
    # Nothing fits the budget: best effort with the smallest working set.
    return 1, min(tn_cands, key=lambda t: _step_bytes(1, t, N, D, Ep))


def soft_hyperedge_generation(x, params, *, num_heads, block_b=None, block_n=None):
    """x: (B, N, D) float32.  Returns (B, N, E) float32 soft assignments."""
    B, N, D = x.shape
    base = params["prototype_base"]        # (E, D)
    w_ctx = params["w_ctx"]                # (2D, E*D)   (in, out) layout
    b_ctx = params["b_ctx"]                # (1, E*D)
    w_proj = params["w_proj"]              # (D, D)      (in, out) layout
    b_proj = params["b_proj"]              # (1, D)
    E = base.shape[0]
    head_dim = D // num_heads
    scale = 1.0 / (float(num_heads) * math.sqrt(float(head_dim)))

    # ---- per-batch prep in plain XLA (tiny; hoisted out of the kernel) ----
    avg = jnp.mean(x, axis=1)                                    # (B, D)
    mx = jnp.max(x, axis=1)                                      # (B, D)
    ctx = jnp.concatenate([avg, mx], axis=-1)                    # (B, 2D)
    offsets = (ctx @ w_ctx + b_ctx).reshape(B, E, D)             # (B, E, D)
    protos = base[None, :, :] + offsets                          # (B, E, D)

    # Pad the hyperedge axis only to the bf16 sublane multiple (16), BEFORE the
    # fuse einsum, so the padded fused weight is produced directly (no extra
    # HBM pad copy of the largest intermediate).
    Ep = ((E + 15) // 16) * 16
    protos_p = jnp.pad(protos, ((0, 0), (0, Ep - E), (0, 0)))    # (B, Ep, D)

    # Algebraic fusion of pre_head_proj + head-mean + 1/sqrt(head_dim):
    #   logits^T = [scale * protos @ w_proj^T] @ X^T + scale * protos @ b_proj^T
    w_pe_t = (jnp.einsum("beo,fo->bef", protos_p, w_proj)
              * scale).astype(jnp.bfloat16)                      # (B, Ep, D) bf16
    b_pe = (jnp.einsum("o,beo->be", b_proj.reshape(-1), protos_p)
            * scale)[..., None].astype(jnp.float32)              # (B, Ep, 1) f32
    x_bf = x.astype(jnp.bfloat16)

    # ---- byte-based, generation-aware block sizing ----
    try:
        vmem_cap = int(pltpu.get_tpu_info().vmem_capacity_bytes)
    except Exception:
        vmem_cap = 64 << 20            # conservative: v7x per-TensorCore VMEM
    budget = min(48 << 20, (vmem_cap * 3) // 8)   # ~24 MiB v7x, 48 MiB v5e/v6e

    bb_auto, tn_auto = _choose_blocks(B, N, D, Ep, budget)
    bb = bb_auto if block_b is None else block_b
    tn = tn_auto if block_n is None else block_n
    assert B % bb == 0, "block_b must divide the batch size"
    assert N % tn == 0, "block_n must divide the node count"
    num_n = N // tn

    step_bytes = _step_bytes(bb, tn, N, D, Ep)
    vmem_limit = int(max(32 << 20,
                         min(vmem_cap - (2 << 20), step_bytes + (8 << 20))))

    out_t = pl.pallas_call(
        functools.partial(_logits_softmax_kernel, num_n=num_n, tn=tn),
        out_shape=jax.ShapeDtypeStruct((B, Ep, N), jnp.float32),
        grid=(B // bb, num_n),
        in_specs=[
            pl.BlockSpec((bb, tn, D), lambda i, n: (i, n, 0)),   # X (bf16)
            pl.BlockSpec((bb, Ep, D), lambda i, n: (i, 0, 0)),   # W_pe^T (bf16)
            pl.BlockSpec((bb, Ep, 1), lambda i, n: (i, 0, 0)),   # bias (f32)
        ],
        out_specs=pl.BlockSpec((bb, Ep, N), lambda i, n: (i, 0, 0)),
        compiler_params=pltpu.CompilerParams(
            dimension_semantics=("parallel", "arbitrary"),
            vmem_limit_bytes=vmem_limit),
    )(x_bf, w_pe_t, b_pe)

    # Undo the transposed, sublane-padded kernel layout.  This only touches a
    # (B, E, N) array (small when E << D), unlike the old 128-lane-padded
    # (B, N, 128) slice copy.
    return jnp.swapaxes(out_t[:, :E, :], 1, 2)


def init_params(key, node_dim, num_hyperedges):
    """Deterministic synthetic parameter init (shapes match the nn.Module)."""
    k1, k2, k3, k4, k5 = jax.random.split(key, 5)
    D, E = node_dim, num_hyperedges
    bound_proto = math.sqrt(6.0 / (E + D))
    prototype_base = jax.random.uniform(k1, (E, D), jnp.float32,
                                        -bound_proto, bound_proto)
    bound_ctx = 1.0 / math.sqrt(2 * D)
    w_ctx = jax.random.uniform(k2, (2 * D, E * D), jnp.float32,
                               -bound_ctx, bound_ctx)
    b_ctx = jax.random.uniform(k3, (1, E * D), jnp.float32,
                               -bound_ctx, bound_ctx)
    bound_p = 1.0 / math.sqrt(D)
    w_proj = jax.random.uniform(k4, (D, D), jnp.float32, -bound_p, bound_p)
    b_proj = jax.random.uniform(k5, (1, D), jnp.float32, -bound_p, bound_p)
    return dict(prototype_base=prototype_base, w_ctx=w_ctx, b_ctx=b_ctx,
                w_proj=w_proj, b_proj=b_proj)


def reference_forward(x, params, *, num_heads):
    """Pure-JAX replica of the PyTorch forward (eval mode)."""
    B, N, D = x.shape
    E = params["prototype_base"].shape[0]
    head_dim = D // num_heads
    avg = jnp.mean(x, axis=1)
    mx = jnp.max(x, axis=1)
    ctx = jnp.concatenate([avg, mx], axis=-1)                      # (B, 2D)
    offsets = (ctx @ params["w_ctx"] + params["b_ctx"]).reshape(B, E, D)
    protos = params["prototype_base"][None] + offsets              # (B, E, D)
    x_proj = x @ params["w_proj"] + params["b_proj"]               # (B, N, D)
    xh = x_proj.reshape(B, N, num_heads, head_dim).transpose(0, 2, 1, 3)
    ph = protos.reshape(B, E, num_heads, head_dim).transpose(0, 2, 1, 3)
    logits = jnp.einsum("bhnd,bhed->bhne", xh, ph) / math.sqrt(head_dim)
    logits = logits.mean(axis=1)                                   # (B, N, E)
    return jax.nn.softmax(logits, axis=1)


if __name__ == "__main__":
    B, N, D = 2, 16, 32
    num_heads = 4
    num_hyperedges = 8

    key = jax.random.PRNGKey(0)
    kx, kp = jax.random.split(key)
    x = jax.random.normal(kx, (B, N, D), jnp.float32)
    params = init_params(kp, D, num_hyperedges)

    fwd = jax.jit(functools.partial(soft_hyperedge_generation,
                                    num_heads=num_heads))
    out = jax.block_until_ready(fwd(x, params))

    ref = reference_forward(x, params, num_heads=num_heads)
    assert out.shape == (B, N, num_hyperedges)
    # Tolerance accommodates the bf16 MXU operands (all accumulation is f32 and
    # the softmax normalization is exact).
    assert jnp.allclose(out, ref, atol=3e-3, rtol=3e-2), "mismatch vs reference"

    print("KERNEL_OK")
</pallas_src>

<mosaic_0001>
module attributes {stable_mosaic.version = 11 : i64} {
  func.func @_logits_softmax_kernel(%arg0: i32, %arg1: i32, %arg2: memref<1x16x32xbf16, #tpu.memory_space<vmem>>, %arg3: memref<1x16x32xbf16, #tpu.memory_space<vmem>>, %arg4: memref<1x16x1xf32, #tpu.memory_space<vmem>>, %arg5: memref<1x16x16xf32, #tpu.memory_space<vmem>>) attributes {dimension_semantics = [#tpu.dimension_semantics<parallel>, #tpu.dimension_semantics<arbitrary>], iteration_bounds = array<i64: 2, 1>, scalar_prefetch = 0 : i64, scratch_operands = 0 : i64, tpu.core_type = #tpu.core_type<tc>, window_params = [{transform_indices = @transform_0, window_bounds = array<i64: 1, 16, 32>}, {transform_indices = @transform_1, window_bounds = array<i64: 1, 16, 32>}, {transform_indices = @transform_2, window_bounds = array<i64: 1, 16, 1>}, {transform_indices = @transform_3, window_bounds = array<i64: 1, 16, 16>}]} {
    %c0 = arith.constant 0 : index
    %c0_0 = arith.constant 0 : index
    %c0_1 = arith.constant 0 : index
    %0 = vector.load %arg3[%c0, %c0_0, %c0_1] : memref<1x16x32xbf16, #tpu.memory_space<vmem>>, vector<1x16x32xbf16>
    %c0_2 = arith.constant 0 : index
    %c0_3 = arith.constant 0 : index
    %c0_4 = arith.constant 0 : index
    %1 = vector.load %arg2[%c0_2, %c0_3, %c0_4] : memref<1x16x32xbf16, #tpu.memory_space<vmem>>, vector<1x16x32xbf16>
    "tpu.trace_start"() <{level = 10 : i32, message = "bef,bnf->ben"}> : () -> ()
    %cst = arith.constant dense<0.000000e+00> : vector<1x16x16xf32>
    %2 = tpu.matmul %0, %1, %cst {dimension_numbers = #tpu.dot_dimension_numbers<[2], [2], [1], [1], [0, 0, 0, 1, 1, 1], [0], [0]>} : vector<1x16x32xbf16>, vector<1x16x32xbf16>, vector<1x16x16xf32> -> vector<1x16x16xf32>
    "tpu.trace_stop"() : () -> ()
    %c0_5 = arith.constant 0 : index
    %c0_6 = arith.constant 0 : index
    %c0_7 = arith.constant 0 : index
    %3 = vector.load %arg4[%c0_5, %c0_6, %c0_7] : memref<1x16x1xf32, #tpu.memory_space<vmem>>, vector<1x16x1xf32>
    %4 = vector.broadcast %3 : vector<1x16x1xf32> to vector<1x16x16xf32>
    %5 = arith.addf %2, %4 : vector<1x16x16xf32>
    %cst_8 = arith.constant dense<0xFF800000> : vector<1x16xf32>
    %6 = vector.multi_reduction <maximumf>, %5, %cst_8 [2] : vector<1x16x16xf32> to vector<1x16xf32>
    %7 = vector.shape_cast %6 : vector<1x16xf32> to vector<1x16x1xf32>
    %8 = vector.broadcast %7 : vector<1x16x1xf32> to vector<1x16x16xf32>
    %9 = arith.subf %5, %8 : vector<1x16x16xf32>
    %10 = math.exp %9 : vector<1x16x16xf32>
    %cst_9 = arith.constant dense<0.000000e+00> : vector<1x16xf32>
    %11 = vector.multi_reduction <add>, %10, %cst_9 [2] : vector<1x16x16xf32> to vector<1x16xf32>
    %12 = vector.shape_cast %11 : vector<1x16xf32> to vector<1x16x1xf32>
    %13 = tpu.reciprocal %12 : vector<1x16x1xf32> -> vector<1x16x1xf32>
    %14 = vector.broadcast %13 : vector<1x16x1xf32> to vector<1x16x16xf32>
    %15 = arith.mulf %10, %14 : vector<1x16x16xf32>
    %c0_10 = arith.constant 0 : index
    %c0_11 = arith.constant 0 : index
    %c0_12 = arith.constant 0 : index
    %16 = vector.load %arg5[%c0_10, %c0_11, %c0_12] : memref<1x16x16xf32, #tpu.memory_space<vmem>>, vector<1x16x16xf32>
    tpu.vector_store %arg5[%c0_10, %c0_11, %c0_12], %15 {strides = array<i32>} : memref<1x16x16xf32, #tpu.memory_space<vmem>>, vector<1x16x16xf32>,
    return
  }
  func.func @transform_0(%arg0: i32, %arg1: i32) -> (i32, i32, i32) {
    %c0_i32 = arith.constant 0 : i32
    %c0_i32_0 = arith.constant 0 : i32
    return %arg0, %arg1, %c0_i32 : i32, i32, i32
  }
  func.func @transform_1(%arg0: i32, %arg1: i32) -> (i32, i32, i32) {
    %c0_i32 = arith.constant 0 : i32
    %c0_i32_0 = arith.constant 0 : i32
    %c0_i32_1 = arith.constant 0 : i32
    return %arg0, %c0_i32, %c0_i32_0 : i32, i32, i32
  }
  func.func @transform_2(%arg0: i32, %arg1: i32) -> (i32, i32, i32) {
    %c0_i32 = arith.constant 0 : i32
    %c0_i32_0 = arith.constant 0 : i32
    %c0_i32_1 = arith.constant 0 : i32
    return %arg0, %c0_i32, %c0_i32_0 : i32, i32, i32
  }
  func.func @transform_3(%arg0: i32, %arg1: i32) -> (i32, i32, i32) {
    %c0_i32 = arith.constant 0 : i32
    %c0_i32_0 = arith.constant 0 : i32
    %c0_i32_1 = arith.constant 0 : i32
    return %arg0, %c0_i32, %c0_i32_0 : i32, i32, i32
  }
}

</mosaic_0001>

<bundles_post_ra>
// kernel: soft_hyperedge_generation.1
= control target key start
LH: loop header
LB: loop body
LE: loop exit
PB: predicated region body
PF: predicated region fallthrough
CT: control target
= control target key end

     0   :  { %s547_s12 = smov 0   ;;  %s549_s13 = smov 0   ;;  %s600_s0 = inlined_call_operand.vmem [shape: bf16[2,16,32], index: 0, kind: input, shape index: {}]   ;;  %s601_s1 = inlined_call_operand.vmem [shape: bf16[2,16,32], index: 1, kind: input, shape index: {}]   ;;  %s602_s2 = inlined_call_operand.vmem [shape: f32[2,16,1], index: 2, kind: input, shape index: {}]   ;;  %s603_s3 = inlined_call_operand.vmem [shape: f32[2,16,16], index: 3, kind: output, shape index: {}]  }
   0x1   :  { %s551_s14 = smov 0  }
   0x2 LB: > { %s25_s15 = sadd.s32 1, %s518_s13  ;;  %p436_p0 = scmp.ge.s32.totalorder %s522_s14, 1  ;;  %s522_s14 = sphi %s551_s14, %s13_s14   ;;  %s518_s13 = sphi %s549_s13, %s605_s13   ;;  %s514_s12 = sphi %s547_s12, %s604_s12  }
   0x3   : > { %p27_p1 = scmp.ge.s32.totalorder %s25_s15, 2  ;;  %p176_p2 = scmp.lt.s32.totalorder %s522_s14, 3 }
   0x5   : > { %s607_s15 = smov (%p27_p1, %s25_s15), 0  ;;  %p177_p3 = pnand %p436_p0, %p176_p2 }
   0x6   : > { %p215_p4 = scmp.lt.s32.totalorder (!%p177_p3), %s514_s12, 1 }
   0x7   : > { %180 = sbr.rel (%p177_p3) target bundleno = 536 (0x218), region = 32 }
   0xc   : > { %v524_v0 = vmov 0.0   ;;  %vm525_vm0 = vmmov 0   ;;  %s609_s12 = smov (!%p215_p4, %s514_s12), 1  ;;  %v526_v1 = vmov 0   ;;  %vm266_vm1 = vcmask 261120  }
   0xd   : > { %456 = vmatprep.subr.bf16.mxu0 %v524_v0  ;;  %458 = vmatprep.mubr.msk.bf16.mxu0 %vm525_vm0, %v524_v0  ;;  %s450_s16 = sshll.u32 %s609_s12, 3  ;;  %s452_s17 = sshll.u32 %s609_s12, 4  ;;  %vm314_vm2 = vcmask 130048  }
   0xe   : > { %489 = vset.pattern.permute.xlu0 %v526_v1  ;;  %s222_s20 = scalar_lea.vmem %s600_s0, %s450_s16  ;;  %s228_s23 = scalar_lea.vmem %s601_s1, %s450_s16 }
   0xf   : > { %s233_s26 = scalar_lea.vmem %s602_s2, %s452_s17  ;;  %v490_v2 = vld [vmem:[%s222_s20] sm:$0xff]   ;;  %s238_s29 = scalar_lea.vmem %s603_s3, %s452_s17 }
  0x10   : > { %v244_v3 = vld [vmem:[%s233_s26] sm:$0xff]  ;;  %v271_v4 = vsel %vm266_vm1, %v490_v2, 0  ;;  %v245_v5 = vld [vmem:[%s233_s26 + $0x8] sm:$0xff] }
  0x11   : > { %248 = vperm.xlu0 %489, %v244_v3   ;;  %457 = vmatpush3.bf16.xpose.msra.mxu0 %v271_v4  ;;  %v491_v6 = vld [vmem:[%s228_s23] sm:$0xff]  }
  0x15   : > { %253 = vperm.xlu0 %489, %v245_v5  }
  0x18   : > { %459 = vmatmul.mubr.msk.bf16.vlgmr.msra.gmra.mxu0 %vm266_vm1, %v491_v6 }
  0x8c   : > { %v249_v7 = vpop.permute.xlu0 %248 }
  0x90   : > { %v254_v12 = vpop.permute.xlu0 %253 }
  0xd8   : > { %v307_v8 = vpop.f32.mrf.mxu0 }
  0xd9   : > { %v308_v9 = vadd.f32 %v307_v8, %v249_v7 }
  0xda   : > { %v460_v10 = vpop.f32.mrf.mxu0 }
  0xdb   : > { %v315_v11 = vsel %vm314_vm2, %v308_v9, -inf }
  0xdc   : > { %316 = vmax.xlane.f32.xlu1 %v315_v11  ;;  %v310_v13 = vpop.f32.mrf.mxu0 }
  0xdd   : > { %v311_v14 = vadd.f32 %v310_v13, %v254_v12 }
  0xde   : > { %v461_v15 = vpop.f32.mrf.mxu0 }
  0xdf   : > { %v318_v16 = vsel %vm314_vm2, %v311_v14, -inf }
  0xe0   : > { %319 = vmax.xlane.f32.xlu1 %v318_v16 }
 0x165   : > { %v317_v17 = vpop.xlane.xlu1 %316 }
 0x166   : > { %v321_v18 = vsub.f32 %v308_v9, %v317_v17 }
 0x168   : > { %v323_v19 = vmul.f32 1.442695, %v321_v18 }
 0x169   : > { %v320_v20 = vpop.xlane.xlu1 %319 }
 0x16a   : > { %492 = vpow2.f32 %v323_v19  ;;  %v322_v21 = vsub.f32 %v311_v14, %v320_v20 }
 0x16c   : > { %v325_v22 = vmul.f32 1.442695, %v322_v21 }
 0x16e   : > { %494 = vpow2.f32 %v325_v22 }
 0x177   : > { %v493_v23 = vpop.eup %492 }
 0x178   : > { %v327_v24 = vsel %vm314_vm2, %v493_v23, 0.0 }
 0x179   : > { %328 = vadd.xlane.f32.xlu0 %v327_v24 }
 0x17b   : > { %v495_v25 = vpop.eup %494 }
 0x17c   : > { %v330_v26 = vsel %vm314_vm2, %v495_v25, 0.0 }
 0x17d   : > { %331 = vadd.xlane.f32.xlu1 %v330_v26 }
 0x202   : > { %v329_v27 = vpop.xlane.xlu0 %328 }
 0x203   : > { %496 = vrcp.f32 %v329_v27 }
 0x206   : > { %v332_v28 = vpop.xlane.xlu1 %331 }
 0x207   : > { %498 = vrcp.f32 %v332_v28 }
 0x210   : > { %v497_v29 = vpop.eup %496 }
 0x211   : > { %v335_v30 = vmul.f32 %v497_v29, %v493_v23 }
 0x213   : > { %337 = vst.msk [vmem:[%s238_s29] sm:$0xff] %vm314_vm2, %v335_v30 }
 0x214   : > { %v499_v31 = vpop.eup %498 }
 0x215   : > { %v336_v32 = vmul.f32 %v499_v31, %v495_v25 }
 0x217   : > { %338 = vst.msk [vmem:[%s238_s29 + $0x8] sm:$0xff] %vm314_vm2, %v336_v32 }
 0x218 PF: > { %s13_s14 = sadd.s32 1, %s522_s14   ;;  %s604_s12 = smov %s518_s13 }
 0x219   : > { %p10_p5 = scmp.ge.s32.totalorder %s13_s14, 4   ;;  %s605_s13 = smov %s607_s15 }
 0x21b   :  { %12 = sbr.rel (!%p10_p5) target bundleno = 2 (0x2), region = 68 }

</bundles_post_ra>
